<compile_context>
chip_gen: v7x
topology: tpu7x:2x2x1
jax: 0.10.0
libtpu: 0.0.40
codegen_flags: <defaults>
</compile_context>

<pallas_src>
import functools

import jax
import jax.numpy as jnp
from jax import lax
from jax.experimental import pallas as pl
from jax.experimental.pallas import tpu as pltpu


# ---------------------------------------------------------------------------
# Tiling helper
# ---------------------------------------------------------------------------
def _tile(dim, target):
    """Largest tile <= target that divides `dim` and keeps (8,128) alignment.

    Falls back to the full dim (always a legal BlockSpec block).
    """
    if dim <= target:
        return dim
    t = target
    while t >= 128:
        if dim % t == 0:
            return t
        t //= 2
    return dim


# ---------------------------------------------------------------------------
# Tiled linear kernels (P1 + P3: accumulator init/finalize via pl.when)
# ---------------------------------------------------------------------------
def _linear_nobias_kernel(x_ref, w_ref, o_ref, acc_ref):
    @pl.when(pl.program_id(2) == 0)
    def _():
        acc_ref[...] = jnp.zeros_like(acc_ref)

    acc_ref[...] += jnp.dot(x_ref[...], w_ref[...],
                            preferred_element_type=jnp.float32)

    @pl.when(pl.program_id(2) == pl.num_programs(2) - 1)
    def _():
        o_ref[...] = acc_ref[...].astype(o_ref.dtype)


def _linear_bias_kernel(x_ref, w_ref, b_ref, o_ref, acc_ref):
    @pl.when(pl.program_id(2) == 0)
    def _():
        acc_ref[...] = jnp.zeros_like(acc_ref)

    acc_ref[...] += jnp.dot(x_ref[...], w_ref[...],
                            preferred_element_type=jnp.float32)

    @pl.when(pl.program_id(2) == pl.num_programs(2) - 1)
    def _():
        o_ref[...] = (acc_ref[...] + b_ref[...].astype(jnp.float32)
                      ).astype(o_ref.dtype)


def pallas_linear(x2d, w, b=None, *, tm=256, tn=256, tk=256):
    """o = x2d @ w (+ b).  x2d: (M, K), w: (K, N), b: (1, N) or None."""
    M, K = x2d.shape
    K2, N = w.shape
    assert K == K2
    tm = _tile(M, tm)
    tn = _tile(N, tn)
    tk = _tile(K, tk)
    grid = (M // tm, N // tn, K // tk)

    cost = pl.CostEstimate(
        flops=2 * M * N * K,
        transcendentals=0,
        bytes_accessed=int((M * K + K * N + M * N) * x2d.dtype.itemsize),
    )
    cparams = pltpu.CompilerParams(
        dimension_semantics=("parallel", "parallel", "arbitrary"))

    x_spec = pl.BlockSpec((tm, tk), lambda i, j, k: (i, k))
    w_spec = pl.BlockSpec((tk, tn), lambda i, j, k: (k, j))
    o_spec = pl.BlockSpec((tm, tn), lambda i, j, k: (i, j))
    scratch = [pltpu.VMEM((tm, tn), jnp.float32)]
    out_shape = jax.ShapeDtypeStruct((M, N), x2d.dtype)

    if b is None:
        return pl.pallas_call(
            _linear_nobias_kernel,
            out_shape=out_shape,
            grid=grid,
            in_specs=[x_spec, w_spec],
            out_specs=o_spec,
            scratch_shapes=scratch,
            compiler_params=cparams,
            cost_estimate=cost,
        )(x2d, w)

    b2 = b.reshape(1, N)
    b_spec = pl.BlockSpec((1, tn), lambda i, j, k: (0, j))
    return pl.pallas_call(
        _linear_bias_kernel,
        out_shape=out_shape,
        grid=grid,
        in_specs=[x_spec, w_spec, b_spec],
        out_specs=o_spec,
        scratch_shapes=scratch,
        compiler_params=cparams,
        cost_estimate=cost,
    )(x2d, w, b2)


# ---------------------------------------------------------------------------
# Flash-style attention kernel (online softmax across kv tiles, all heads per
# grid step, lane-dense (tq, H*D) output).  values == keys (upstream bug).
# ---------------------------------------------------------------------------
def _flash_attn_kernel(q_ref, k_ref, o_ref, m_ref, l_ref, acc_ref, *, scale):
    kv = pl.program_id(2)

    @pl.when(kv == 0)
    def _():
        m_ref[...] = jnp.full_like(m_ref, -jnp.inf)
        l_ref[...] = jnp.zeros_like(l_ref)
        acc_ref[...] = jnp.zeros_like(acc_ref)

    # Keep MXU inputs in the input dtype (bf16-friendly); accumulate in f32.
    q = q_ref[0] * scale            # (H, tq, D), weak-typed scale keeps dtype
    k = k_ref[0]                    # (H, tkv, D)

    # Batched over heads, contracting the last (D) dims -- no k.T materialized.
    s = lax.dot_general(
        q, k,
        dimension_numbers=(((2,), (2,)), ((0,), (0,))),
        preferred_element_type=jnp.float32)                    # (H, tq, tkv)

    m_prev = m_ref[...]                                        # (H, tq, 1)
    m_new = jnp.maximum(m_prev, jnp.max(s, axis=-1, keepdims=True))
    alpha = jnp.exp(m_prev - m_new)
    p = jnp.exp(s - m_new)                                     # (H, tq, tkv) f32

    l_ref[...] = alpha * l_ref[...] + jnp.sum(p, axis=-1, keepdims=True)
    # NOTE: "values" are the keys (reproducing the upstream vformer bug).
    pv = lax.dot_general(
        p.astype(k.dtype), k,
        dimension_numbers=(((2,), (1,)), ((0,), (0,))),
        preferred_element_type=jnp.float32)                    # (H, tq, D)
    acc_ref[...] = alpha * acc_ref[...] + pv
    m_ref[...] = m_new

    @pl.when(kv == pl.num_programs(2) - 1)
    def _():
        inv_l = pl.reciprocal(l_ref[...], approx=True)         # EUP, ~free
        H = acc_ref.shape[0]
        D = acc_ref.shape[-1]
        # Lane-dense (tq, H*D) output block: one dense HBM writeback, no
        # post-kernel transpose.  Static per-head column stores (H is small).
        for h in range(H):
            o_ref[0, :, h * D:(h + 1) * D] = (
                acc_ref[h] * inv_l[h]).astype(o_ref.dtype)


def pallas_flash_attention(q_bhnd, k_bhnd, *, tq=256, tkv=256):
    """q, k: (B, H, N, D)  ->  out: (B, N, H*D).

    Computes softmax(q k^T / sqrt(D)) @ k  (values == keys, matching the
    upstream module's behaviour).
    """
    B, H, N, D = q_bhnd.shape
    tq = _tile(N, tq)
    tkv = _tile(N, tkv)
    scale = 1.0 / (D ** 0.5)
    grid = (B, N // tq, N // tkv)

    cost = pl.CostEstimate(
        flops=4 * B * H * N * N * D,
        transcendentals=B * H * N * N,
        bytes_accessed=int(3 * B * H * N * D * q_bhnd.dtype.itemsize),
    )

    kernel = functools.partial(_flash_attn_kernel, scale=scale)

    return pl.pallas_call(
        kernel,
        out_shape=jax.ShapeDtypeStruct((B, N, H * D), q_bhnd.dtype),
        grid=grid,
        in_specs=[
            pl.BlockSpec((1, H, tq, D), lambda b, qi, ki: (b, 0, qi, 0)),
            pl.BlockSpec((1, H, tkv, D), lambda b, qi, ki: (b, 0, ki, 0)),
        ],
        out_specs=pl.BlockSpec((1, tq, H * D), lambda b, qi, ki: (b, qi, 0)),
        scratch_shapes=[
            pltpu.VMEM((H, tq, 1), jnp.float32),   # running max  m
            pltpu.VMEM((H, tq, 1), jnp.float32),   # running sum  l
            pltpu.VMEM((H, tq, D), jnp.float32),   # accumulator
        ],
        compiler_params=pltpu.CompilerParams(
            dimension_semantics=("parallel", "parallel", "arbitrary")),
        cost_estimate=cost,
    )(q_bhnd, k_bhnd)


# ---------------------------------------------------------------------------
# Full module forward
# ---------------------------------------------------------------------------
def memory_efficient_attention_forward(x, params, num_heads, head_dim, *,
                                       tq=256, tkv=256,
                                       tile_m=256, tile_n=256, tile_k=256):
    """x: (B, N, dim) -> (B, N, dim)."""
    B, N, dim = x.shape
    inner = num_heads * head_dim

    # to_qkv (bias=False).  The module never uses V in the attention
    # (value_chunk is sliced from `key`), so only project Q and K: this skips
    # one third of the projection FLOPs / HBM traffic.
    w_qk = params["w_qkv"][:, : 2 * inner]
    x2 = x.reshape(B * N, dim)
    qk = pallas_linear(x2, w_qk, None, tm=tile_m, tn=tile_n, tk=tile_k)
    qk = qk.reshape(B, N, 2 * inner)
    q, k = jnp.split(qk, 2, axis=-1)

    # b n (h d) -> b h n d : head-major tiles for the kernel (the kernel then
    # writes a lane-dense (B, N, H*D) output directly, so no post-transpose).
    def to_bhnd(t):
        return t.reshape(B, N, num_heads, head_dim).transpose(0, 2, 1, 3)

    att = pallas_flash_attention(to_bhnd(q), to_bhnd(k), tq=tq, tkv=tkv)
    # att: (B, N, inner), already in the layout required by to_out.

    # to_out: Linear(inner, dim) + Dropout(p=0.0) == identity dropout
    out = pallas_linear(att.reshape(B * N, inner), params["w_out"],
                        params["b_out"], tm=tile_m, tn=tile_n, tk=tile_k)
    return out.reshape(B, N, dim)


# ---------------------------------------------------------------------------
# Pure-JAX reference (same semantics, incl. value==key) for a sanity check
# ---------------------------------------------------------------------------
def reference_forward(x, params, num_heads, head_dim):
    B, N, dim = x.shape
    inner = num_heads * head_dim
    qkv = x @ params["w_qkv"]
    q, k, _ = jnp.split(qkv, 3, axis=-1)
    q = q.reshape(B, N, num_heads, head_dim)
    k = k.reshape(B, N, num_heads, head_dim)
    scale = head_dim ** -0.5
    s = jnp.einsum("bqhd,bkhd->bhqk", q * scale, k)
    p = jax.nn.softmax(s, axis=-1)
    o = jnp.einsum("bhqk,bkhd->bqhd", p, k)                 # value == key
    o = o.reshape(B, N, inner)
    return o @ params["w_out"] + params["b_out"]


# ---------------------------------------------------------------------------
if __name__ == "__main__":
    B, N, dim = 2, 8, 32
    num_heads, head_dim = 2, 16
    inner = num_heads * head_dim

    key = jax.random.PRNGKey(0)
    k1, k2, k3, k4 = jax.random.split(key, 4)
    x = jax.random.normal(k1, (B, N, dim), jnp.float32)
    params = {
        # nn.Linear(dim, 3*inner, bias=False): stored as (dim, 3*inner) = W^T
        "w_qkv": jax.random.normal(k2, (dim, 3 * inner), jnp.float32) * 0.05,
        # nn.Linear(inner, dim) with bias
        "w_out": jax.random.normal(k3, (inner, dim), jnp.float32) * 0.05,
        "b_out": jax.random.normal(k4, (1, dim), jnp.float32) * 0.05,
    }

    out = memory_efficient_attention_forward(x, params, num_heads, head_dim)
    out = jax.block_until_ready(out)

    ref = reference_forward(x, params, num_heads, head_dim)
    assert out.shape == (B, N, dim)
    # Slightly relaxed tolerance: pl.reciprocal(approx=True) uses the EUP
    # approximate reciprocal (~2^-12 relative error).
    assert jnp.allclose(out, ref, atol=1e-3, rtol=1e-2), (
        "mismatch vs reference, max abs err = "
        f"{float(jnp.max(jnp.abs(out - ref)))}")
    print("KERNEL_OK")
</pallas_src>

<mosaic_0001>
module attributes {stable_mosaic.version = 11 : i64} {
  func.func @_linear_nobias_kernel(%arg0: i32, %arg1: i32, %arg2: i32, %arg3: memref<16x32xf32, #tpu.memory_space<vmem>>, %arg4: memref<32x64xf32, #tpu.memory_space<vmem>>, %arg5: memref<16x64xf32, #tpu.memory_space<vmem>>, %arg6: memref<16x64xf32, #tpu.memory_space<vmem>>) attributes {dimension_semantics = [#tpu.dimension_semantics<parallel>, #tpu.dimension_semantics<parallel>, #tpu.dimension_semantics<arbitrary>], iteration_bounds = array<i64: 1, 1, 1>, scalar_prefetch = 0 : i64, scratch_operands = 1 : i64, tpu.core_type = #tpu.core_type<tc>, window_params = [{transform_indices = @transform_0, window_bounds = array<i64: 16, 32>}, {transform_indices = @transform_1, window_bounds = array<i64: 32, 64>}, {transform_indices = @transform_2, window_bounds = array<i64: 16, 64>}]} {
    %c0_i32 = arith.constant 0 : i32
    %0 = arith.cmpi eq, %arg2, %c0_i32 : i32
    %1 = arith.extui %0 : i1 to i32
    %c0_i32_0 = arith.constant 0 : i32
    %2 = arith.cmpi ne, %1, %c0_i32_0 : i32
    scf.if %2 {
      %cst_10 = arith.constant 0.000000e+00 : f32
      %12 = vector.broadcast %cst_10 : f32 to vector<16x64xf32>
      %c0_11 = arith.constant 0 : index
      %c0_12 = arith.constant 0 : index
      %13 = vector.load %arg6[%c0_11, %c0_12] : memref<16x64xf32, #tpu.memory_space<vmem>>, vector<16x64xf32>
      tpu.vector_store %arg6[%c0_11, %c0_12], %12 {strides = array<i32>} : memref<16x64xf32, #tpu.memory_space<vmem>>, vector<16x64xf32>,
    } else {
    }
    %c0 = arith.constant 0 : index
    %c0_1 = arith.constant 0 : index
    %3 = vector.load %arg6[%c0, %c0_1] : memref<16x64xf32, #tpu.memory_space<vmem>>, vector<16x64xf32>
    %c0_2 = arith.constant 0 : index
    %c0_3 = arith.constant 0 : index
    %4 = vector.load %arg3[%c0_2, %c0_3] : memref<16x32xf32, #tpu.memory_space<vmem>>, vector<16x32xf32>
    %c0_4 = arith.constant 0 : index
    %c0_5 = arith.constant 0 : index
    %5 = vector.load %arg4[%c0_4, %c0_5] : memref<32x64xf32, #tpu.memory_space<vmem>>, vector<32x64xf32>
    %cst = arith.constant dense<0.000000e+00> : vector<16x64xf32>
    %6 = tpu.matmul %4, %5, %cst {dimension_numbers = #tpu.dot_dimension_numbers<[1], [0], [0], [1], [0, 0, 1, 1], [], []>} : vector<16x32xf32>, vector<32x64xf32>, vector<16x64xf32> -> vector<16x64xf32>
    %7 = arith.addf %3, %6 : vector<16x64xf32>
    %c0_6 = arith.constant 0 : index
    %c0_7 = arith.constant 0 : index
    %8 = vector.load %arg6[%c0_6, %c0_7] : memref<16x64xf32, #tpu.memory_space<vmem>>, vector<16x64xf32>
    tpu.vector_store %arg6[%c0_6, %c0_7], %7 {strides = array<i32>} : memref<16x64xf32, #tpu.memory_space<vmem>>, vector<16x64xf32>,
    %c0_i32_8 = arith.constant 0 : i32
    %9 = arith.cmpi eq, %arg2, %c0_i32_8 : i32
    %10 = arith.extui %9 : i1 to i32
    %c0_i32_9 = arith.constant 0 : i32
    %11 = arith.cmpi ne, %10, %c0_i32_9 : i32
    scf.if %11 {
      %c0_10 = arith.constant 0 : index
      %c0_11 = arith.constant 0 : index
      %12 = vector.load %arg6[%c0_10, %c0_11] : memref<16x64xf32, #tpu.memory_space<vmem>>, vector<16x64xf32>
      %c0_12 = arith.constant 0 : index
      %c0_13 = arith.constant 0 : index
      %13 = vector.load %arg5[%c0_12, %c0_13] : memref<16x64xf32, #tpu.memory_space<vmem>>, vector<16x64xf32>
      tpu.vector_store %arg5[%c0_12, %c0_13], %12 {strides = array<i32>} : memref<16x64xf32, #tpu.memory_space<vmem>>, vector<16x64xf32>,
    } else {
    }
    return
  }
  func.func @transform_0(%arg0: i32, %arg1: i32, %arg2: i32) -> (i32, i32) {
    %c0_i32 = arith.constant 0 : i32
    return %arg0, %arg2 : i32, i32
  }
  func.func @transform_1(%arg0: i32, %arg1: i32, %arg2: i32) -> (i32, i32) {
    %c0_i32 = arith.constant 0 : i32
    return %arg2, %arg1 : i32, i32
  }
  func.func @transform_2(%arg0: i32, %arg1: i32, %arg2: i32) -> (i32, i32) {
    %c0_i32 = arith.constant 0 : i32
    return %arg0, %arg1 : i32, i32
  }
}

</mosaic_0001>

<bundles_post_ra>
// kernel: tpu_custom_call.1
= control target key start
LH: loop header
LB: loop body
LE: loop exit
PB: predicated region body
PF: predicated region fallthrough
CT: control target
= control target key end

     0   :  { %7 = vsyncpa [#allocation4], 0  ;;  %s344_s0 = inlined_call_operand.hbm [shape: f32[16,32], index: 0, kind: input, shape index: {}]   ;;  %s345_s1 = inlined_call_operand.hbm [shape: f32[32,64], index: 1, kind: input, shape index: {}]   ;;  %s346_s2 = inlined_call_operand.hbm [shape: f32[16,64], index: 2, kind: output, shape index: {}]  }
   0x1   :  { %8 = vsyncpa [#allocation7], 0 }
   0x2   :  { %9 = vsyncpa [#allocation5], 0  ;;  %s272_s9 = smov [#allocation3]   ;;  %s200_s13 = scalar_lea.hbm %s344_s0, 256 }
   0x3   :  { %s15_s10 = sshll.u32 %s272_s9, 4  ;;  %p201_p0 = scmp.ne.s32.totalorder %s344_s0, %s200_s13  ;;  %s16_s10 = int_to_ptr.vmem [resolvable:$true] %s15_s10 }
   0x4   :  { %p204_p1 = scmp.lt.u32.totalorder %s200_s13, %s344_s0 }
   0x6   :  { %p206_p2 = pnand %p204_p1, %p201_p0 }
   0x8   :  { %209 = shalt.err (!%p206_p2)
}
   0x9   :  { %s210_s18 = scalar_lea.vmem %s16_s10, 256  ;;  %p215_p4 = scmp.lt.s32.totalorder %s16_s10, %s16_s10 }
   0xa   :  { %p211_p3 = scmp.ne.s32.totalorder %s16_s10, %s210_s18  ;;  %p216_p5 = scmp.lt.s32.totalorder %s210_s18, %s210_s18 }
   0xc   :  { %p217_p6 = por %p216_p5, %p215_p4 }
   0xe   :  { %p218_p7 = pnand %p217_p6, %p211_p3 }
  0x10   :  { %221 = shalt.err (!%p218_p7)
}
  0x11   :  { %s273_s19 = smov 128   ;;  %s274_s20 = smov 8  }
  0x12   :  { %21 = dma.hbm_to_vmem [thread:$0]  %s344_s0, 256, %s16_s10, [#allocation4], %s273_s19, %s273_s19, %s274_s20  }
  0x13   :  { %s275_s23 = smov [#allocation6]   ;;  %s222_s27 = scalar_lea.hbm %s345_s1, 512 }
  0x14   :  { %s27_s24 = sshll.u32 %s275_s23, 4  ;;  %p223_p8 = scmp.ne.s32.totalorder %s345_s1, %s222_s27  ;;  %s28_s24 = int_to_ptr.vmem [resolvable:$true] %s27_s24 }
  0x15   :  { %p226_p9 = scmp.lt.u32.totalorder %s222_s27, %s345_s1 }
  0x17   :  { %p228_p10 = pnand %p226_p9, %p223_p8 }
  0x19   :  { %231 = shalt.err (!%p228_p10)
}
  0x1a   :  { %s232_s4 = scalar_lea.vmem %s28_s24, 512  ;;  %p237_p12 = scmp.lt.s32.totalorder %s28_s24, %s28_s24 }
  0x1b   :  { %p233_p11 = scmp.ne.s32.totalorder %s28_s24, %s232_s4  ;;  %p238_p13 = scmp.lt.s32.totalorder %s232_s4, %s232_s4 }
  0x1d   :  { %p239_p0 = por %p238_p13, %p237_p12 }
  0x1f   :  { %p240_p1 = pnand %p239_p0, %p233_p11 }
  0x21   :  { %243 = shalt.err (!%p240_p1)
}
  0x22   :  { %33 = dma.hbm_to_vmem [thread:$0]  %s345_s1, 512, %s28_s24, [#allocation7], %s273_s19, %s273_s19, %s274_s20  }
  0x23   :  { %266 = dma.done.wait [#allocation4], 256  }
  0x24   :  { %267 = vsyncadd [#allocation4], 4294967040 }
  0x25   :  { %268 = dma.done.wait [#allocation7], 512  }
  0x26   :  { %269 = vsyncadd [#allocation7], 4294966784  ;;  %vm44_vm0 = vcmask 523264   ;;  %v276_v0 = vmov 0.0   ;;  %vm55_vm1 = vcmask 261120   ;;  %v51_v1 = vld [vmem:[#allocation6] sm:$0xff] }
  0x27   :  { %46 = vst.msk [vmem:[#allocation2 + $0x8] sm:$0xff] %vm44_vm0, %v276_v0  ;;  %45 = vst.msk [vmem:[#allocation2] sm:$0xff] %vm44_vm0, %v276_v0  ;;  %v52_v2 = vld [vmem:[#allocation6 + $0x8] sm:$0xff]  ;;  %v53_v3 = vld [vmem:[#allocation6 + $0x10] sm:$0xff]  ;;  %s277_s1 = smov [#allocation8]  }
  0x28   :  { %v186_v4 = vpack.c.bf16 %v52_v2, %v51_v1  ;;  %v54_v5 = vld [vmem:[#allocation6 + $0x18] sm:$0xff]  ;;  %v49_v6 = vld [vmem:[#allocation3] sm:$0xff]  ;;  %s154_s6 = sshll.u32 %s277_s1, 4  ;;  %s155_s6 = int_to_ptr.vmem [resolvable:$true] %s154_s6 }
  0x29   :  { %v190_v7 = vpack.c.bf16 %v54_v5, %v53_v3  ;;  %183 = vmatprep.mubr.msk.f32.mxu0 %vm55_vm1, %v49_v6  ;;  %v50_v8 = vld [vmem:[#allocation3 + $0x8] sm:$0xff]  ;;  %s244_s7 = scalar_lea.vmem %s155_s6, 256  ;;  %p249_p3 = scmp.lt.s32.totalorder %s155_s6, %s155_s6 }
  0x2a   :  { %187 = vmatprep.subr.bf16.mxu0 %v186_v4  ;;  %p245_p2 = scmp.ne.s32.totalorder %s155_s6, %s244_s7  ;;  %p250_p4 = scmp.lt.s32.totalorder %s244_s7, %s244_s7 }
  0x2b   :  { %189 = vmatpush3.bf16.msra.mxu0 %v186_v4 }
  0x2c   :  { %191 = vmatprep.subr.bf16.mxu0 %v190_v7  ;;  %p251_p5 = por %p250_p4, %p249_p3 }
  0x2e   :  { %v48_v9 = vld [vmem:[#allocation2 + $0x8] sm:$0xff]  ;;  %v47_v10 = vld [vmem:[#allocation2] sm:$0xff]  ;;  %p252_p6 = pnand %p251_p5, %p245_p2 }
  0x2f   :  { %193 = vmatpush3.bf16.msra.mxu0 %v190_v7 }
  0x32   :  { %184 = vmatmul.mubr.msk.f32.vlgmr.msra.gmra.mrb[0].mxu0 %vm55_vm1, %v50_v8 }
 0x105   :  { %v185_v11 = vpop.f32.mrb[0].mxu0 }
 0x106   :  { %v138_v12 = vadd.f32 %v185_v11, %v48_v9  ;;  %v128_v13 = vpop.f32.mrb[1].mxu0 }
 0x107   :  { %v137_v14 = vadd.f32 %v128_v13, %v47_v10 }
 0x108   :  { %141 = vst.msk [vmem:[#allocation2 + $0x8] sm:$0xff] %vm44_vm0, %v138_v12 }
 0x109   :  { %140 = vst.msk [vmem:[#allocation2] sm:$0xff] %vm44_vm0, %v137_v14 }
 0x10f   :  { %v146_v15 = vld [vmem:[#allocation2 + $0x8] sm:$0xff] }
 0x110   :  { %v145_v16 = vld [vmem:[#allocation2] sm:$0xff]  ;;  %148 = vst.msk [vmem:[#allocation8 + $0x8] sm:$0xff] %vm44_vm0, %v146_v15 }
 0x111   :  { %147 = vst.msk [vmem:[#allocation8] sm:$0xff] %vm44_vm0, %v145_v16 }
 0x112   :  { %255 = shalt.err (!%p252_p6)
}
 0x113   :  { %s256_s10 = scalar_lea.hbm %s346_s2, 256 }
 0x114   :  { %p257_p7 = scmp.ne.s32.totalorder %s346_s2, %s256_s10  ;;  %p260_p8 = scmp.lt.u32.totalorder %s256_s10, %s346_s2 }
 0x116   :  { %p262_p9 = pnand %p260_p8, %p257_p7 }
 0x118   :  { %265 = shalt.err (!%p262_p9)
}
 0x119   :  { %160 = dma.vmem_to_hbm [thread:$0]  %s155_s6, 256, %s346_s2, [#allocation5], %s273_s19, %s273_s19, %s274_s20  }
 0x11a   :  { %270 = dma.done.wait [#allocation5], 256  }
 0x11b   :  { %271 = vsyncadd [#allocation5], 4294967040 }
 0x11c   :  { %164 = vsyncpa [#allocation4], 1 }
 0x11d   :  { %165 = vsyncpa [#allocation7], 1 }
 0x11e   :  { %166 = vsyncpa [#allocation5], 1 }

</bundles_post_ra>
